<compile_context>
chip_gen: v5e
topology: v5e:2x2
jax: 0.10.0
libtpu: 0.0.40
codegen_flags: <defaults>
</compile_context>

<pallas_src>
import functools

import jax
import jax.numpy as jnp
from jax.experimental import pallas as pl
from jax.experimental.pallas import tpu as pltpu


# ---------------------------------------------------------------------------
# VMEM budgeting (generation-aware: ~64 MiB/TC on v7x, 128 MiB on v5e/v6e).
# ---------------------------------------------------------------------------
def _vmem_capacity_bytes():
    try:
        return int(pltpu.get_tpu_info().vmem_capacity_bytes)
    except Exception:
        return 64 * 1024 * 1024  # conservative fallback (v7x per-TC size)


def _pick_block_hw(C, HW, itemsize, budget_bytes):
    """Largest multiple-of-128 lane count for a (C, blk) streaming tile such that
    pass-2's double-buffered in+out tiles (+ one f32 temp) fit the VMEM budget,
    capped at ~4 MiB per tile (streaming is at HBM roofline past ~512 lanes)."""
    if HW <= 128:
        return HW
    per_lane_native = C * itemsize
    denom = 4 * per_lane_native + 4 * C            # 2x in + 2x out + f32 temp (per lane)
    max_lanes_budget = max(128, budget_bytes // denom)
    max_lanes_cap = max(128, (4 * 1024 * 1024) // per_lane_native)
    blk = min(HW, max_lanes_budget, max_lanes_cap)
    return max(128, (blk // 128) * 128)


# ---------------------------------------------------------------------------
# Fused single-pass kernel: pool + MLP + sigmoid + gate in one HBM round trip.
# ---------------------------------------------------------------------------
def _fused_kernel(x_ref, w1_ref, b1_ref, w2_ref, b2_ref, o_ref, *, hw):
    # x_ref / o_ref: (1, C, HW) in the caller's dtype. Compute in f32 in-register.
    xf = x_ref[...].astype(jnp.float32)                       # (1, C, HW)
    avg_p = jnp.sum(xf, axis=-1) * jnp.float32(1.0 / hw)      # (1, C)
    max_p = jnp.max(xf, axis=-1)                              # (1, C)

    w1 = w1_ref[...].astype(jnp.float32)                      # (C, Ch)
    b1 = b1_ref[...].astype(jnp.float32)                      # (1, Ch)
    w2 = w2_ref[...].astype(jnp.float32)                      # (Ch, C)
    b2 = b2_ref[...].astype(jnp.float32)                      # (1, C)

    def mlp(p):  # (1, C) -> (1, C); O(C^2/r) flops -> negligible, keep on the VPU.
        h = jnp.sum(p[:, :, None] * w1[None, :, :], axis=1) + b1      # (1, Ch)
        h = jnp.maximum(h, 0.0)
        return jnp.sum(h[:, :, None] * w2[None, :, :], axis=1) + b2   # (1, C)

    scale = jax.nn.sigmoid(mlp(avg_p) + mlp(max_p))           # (1, C) f32
    o_ref[...] = (xf * scale[:, :, None]).astype(o_ref.dtype)


# ---------------------------------------------------------------------------
# Fallback pass 1: streamed global avg/max pooling with ragged-tail masking.
# ---------------------------------------------------------------------------
def _pool_kernel(x_ref, sum_ref, max_ref, sum_acc, max_acc, *, hw, blk):
    j = pl.program_id(1)
    x = x_ref[...].astype(jnp.float32)                        # (1, C, blk)

    if hw % blk != 0:
        lane = jax.lax.broadcasted_iota(jnp.int32, x.shape, dimension=2)
        valid = (j * blk + lane) < hw
        x_sum = jnp.where(valid, x, 0.0)
        x_max = jnp.where(valid, x, -jnp.inf)
    else:
        x_sum = x
        x_max = x

    psum = jnp.sum(x_sum, axis=-1)[:, None, :]                # (1, 1, C)
    pmax = jnp.max(x_max, axis=-1)[:, None, :]                # (1, 1, C)

    @pl.when(j == 0)
    def _():
        sum_acc[...] = psum
        max_acc[...] = pmax

    @pl.when(j > 0)
    def _():
        sum_acc[...] = sum_acc[...] + psum
        max_acc[...] = jnp.maximum(max_acc[...], pmax)

    @pl.when(j == pl.num_programs(1) - 1)
    def _():
        sum_ref[...] = sum_acc[...]
        max_ref[...] = max_acc[...]


# ---------------------------------------------------------------------------
# Fallback pass 2: apply the per-(b, c) sigmoid gate (lane-dense, native dtype).
# ---------------------------------------------------------------------------
def _apply_kernel(scale_ref, x_ref, o_ref):
    # scale_ref: (1, C, 1) f32; x_ref/o_ref: (1, C, blk) native dtype.
    # Multiply in f32 (v5e VPU has no bf16), store in the caller's dtype.
    xf = x_ref[...].astype(jnp.float32)
    o_ref[...] = (xf * scale_ref[...]).astype(o_ref.dtype)


# ---------------------------------------------------------------------------
# Wrapper.
# ---------------------------------------------------------------------------
def _channel_gate_impl(x_nchw, w1, b1, w2, b2, force_two_pass=False):
    B, C, H, W = x_nchw.shape
    HW = H * W
    out_dtype = x_nchw.dtype
    itemsize = jnp.dtype(out_dtype).itemsize
    Ch = w1.shape[1]

    x_flat = x_nchw.reshape(B, C, HW)          # native dtype: no f32 up-cast in HBM

    vmem_cap = _vmem_capacity_bytes()
    vmem_limit = int(vmem_cap * 0.85)
    budget = int(vmem_cap * 0.60)

    # Fused-path footprint: double-buffered (1, C, HW) in + out slabs (native dtype)
    # + one in-kernel f32 slab temp + the tiny MLP weights.
    slab = C * HW * itemsize
    weights_bytes = 4 * (C * Ch + Ch + Ch * C + C)
    fused_footprint = 4 * slab + 4 * C * HW + weights_bytes

    if (not force_two_pass) and fused_footprint <= budget:
        # TODO(synk): with B == 1 on v7x the single "parallel" axis leaves one
        # TensorCore idle; could split HW into 2 outer parallel segments.
        # TODO(synk): add input_output_aliases={0: 0} when the caller donates x.
        out = pl.pallas_call(
            functools.partial(_fused_kernel, hw=HW),
            out_shape=jax.ShapeDtypeStruct((B, C, HW), out_dtype),
            grid_spec=pltpu.PrefetchScalarGridSpec(
                num_scalar_prefetch=0,
                grid=(B,),
                in_specs=[pl.BlockSpec((1, C, HW), lambda b: (b, 0, 0)),
                          pl.BlockSpec((C, Ch), lambda b: (0, 0)),
                          pl.BlockSpec((1, Ch), lambda b: (0, 0)),
                          pl.BlockSpec((Ch, C), lambda b: (0, 0)),
                          pl.BlockSpec((1, C), lambda b: (0, 0))],
                out_specs=pl.BlockSpec((1, C, HW), lambda b: (b, 0, 0))),
            compiler_params=pltpu.CompilerParams(
                dimension_semantics=("parallel",),
                vmem_limit_bytes=vmem_limit),
        )(x_flat, w1, b1.reshape(1, Ch), w2, b2.reshape(1, C))
        return out.reshape(B, C, H, W)

    # -------- Two-pass streaming fallback for huge (C, HW) slabs -------------
    blk = _pick_block_hw(C, HW, itemsize, budget)
    n_blk = pl.cdiv(HW, blk)

    sum_out, max_out = pl.pallas_call(
        functools.partial(_pool_kernel, hw=HW, blk=blk),
        out_shape=(jax.ShapeDtypeStruct((B, 1, C), jnp.float32),
                   jax.ShapeDtypeStruct((B, 1, C), jnp.float32)),
        grid_spec=pltpu.PrefetchScalarGridSpec(
            num_scalar_prefetch=0,
            grid=(B, n_blk),
            in_specs=[pl.BlockSpec((1, C, blk), lambda b, j: (b, 0, j))],
            out_specs=(pl.BlockSpec((1, 1, C), lambda b, j: (b, 0, 0)),
                       pl.BlockSpec((1, 1, C), lambda b, j: (b, 0, 0))),
            scratch_shapes=[pltpu.VMEM((1, 1, C), jnp.float32),
                            pltpu.VMEM((1, 1, C), jnp.float32)]),
        compiler_params=pltpu.CompilerParams(
            dimension_semantics=("parallel", "arbitrary"),
            vmem_limit_bytes=vmem_limit),
    )(x_flat)

    # Tiny MLP + sigmoid in plain JAX (negligible flops; avg/max fused as (2B, C)).
    avg_p = sum_out.reshape(B, C) / jnp.float32(HW)
    max_p = max_out.reshape(B, C)
    pooled = jnp.concatenate([avg_p, max_p], axis=0)
    h = jnp.maximum(pooled @ w1.astype(jnp.float32) + b1.astype(jnp.float32), 0.0)
    att2 = h @ w2.astype(jnp.float32) + b2.astype(jnp.float32)
    att = att2[:B] + att2[B:]
    scale = jax.nn.sigmoid(att).reshape(B, C, 1).astype(jnp.float32)

    # TODO(synk): add input_output_aliases={1: 0} here when the caller donates x.
    out = pl.pallas_call(
        _apply_kernel,
        out_shape=jax.ShapeDtypeStruct((B, C, HW), out_dtype),
        grid_spec=pltpu.PrefetchScalarGridSpec(
            num_scalar_prefetch=0,
            grid=(B, n_blk),
            in_specs=[pl.BlockSpec((1, C, 1), lambda b, j: (b, 0, 0)),
                      pl.BlockSpec((1, C, blk), lambda b, j: (b, 0, j))],
            out_specs=pl.BlockSpec((1, C, blk), lambda b, j: (b, 0, j))),
        compiler_params=pltpu.CompilerParams(
            dimension_semantics=("parallel", "parallel"),
            vmem_limit_bytes=vmem_limit),
    )(scale, x_flat)

    return out.reshape(B, C, H, W)


@functools.partial(jax.jit, static_argnames=("force_two_pass",))
def channel_gate(x, w1, b1, w2, b2, force_two_pass=False):
    return _channel_gate_impl(x, w1, b1, w2, b2, force_two_pass)


# ---------------------------------------------------------------------------
# Pure-JAX reference of the PyTorch forward pass.
# ---------------------------------------------------------------------------
def channel_gate_ref(x, w1, b1, w2, b2):
    B, C, H, W = x.shape
    xf = x.reshape(B, C, H * W).astype(jnp.float32)
    avg_p = xf.mean(axis=-1)
    max_p = xf.max(axis=-1)

    def mlp(p):
        h = jnp.maximum(p @ w1 + b1, 0.0)
        return h @ w2 + b2

    att = mlp(avg_p) + mlp(max_p)
    scale = jax.nn.sigmoid(att)[:, :, None, None]
    return (x.astype(jnp.float32) * scale).astype(x.dtype)


if __name__ == "__main__":
    # gate_channels must be divisible by reduction_ratio=16 -> C=32, hidden=2.
    B, C, H, W = 2, 32, 16, 16
    reduction_ratio = 16
    Ch = C // reduction_ratio

    key = jax.random.PRNGKey(0)
    kx, kw1, kb1, kw2, kb2 = jax.random.split(key, 5)

    x = jax.random.normal(kx, (B, C, H, W), dtype=jnp.float32)
    # nn.Linear(C, C//r) / nn.Linear(C//r, C) weights, stored as (in, out).
    w1 = jax.random.normal(kw1, (C, Ch), dtype=jnp.float32) * 0.1
    b1 = jax.random.normal(kb1, (Ch,), dtype=jnp.float32) * 0.1
    w2 = jax.random.normal(kw2, (Ch, C), dtype=jnp.float32) * 0.1
    b2 = jax.random.normal(kb2, (C,), dtype=jnp.float32) * 0.1

    # Main (fused single-pass) path.
    out = jax.block_until_ready(channel_gate(x, w1, b1, w2, b2))
    ref = channel_gate_ref(x, w1, b1, w2, b2)
    assert out.shape == (B, C, H, W)
    assert jnp.allclose(out, ref, atol=1e-5, rtol=1e-5), "fused path mismatch"

    # Streaming two-pass fallback (ragged HW = 12*12 = 144 exercises cdiv + mask).
    x2 = jax.random.normal(kx, (B, C, 12, 12), dtype=jnp.float32)
    out2 = jax.block_until_ready(
        channel_gate(x2, w1, b1, w2, b2, force_two_pass=True))
    ref2 = channel_gate_ref(x2, w1, b1, w2, b2)
    assert jnp.allclose(out2, ref2, atol=1e-5, rtol=1e-5), "two-pass path mismatch"

    print("KERNEL_OK")
</pallas_src>

<mosaic_0001>
module attributes {stable_mosaic.version = 11 : i64} {
  func.func @_fused_kernel(%arg0: i32, %arg1: memref<1x32x256xf32, #tpu.memory_space<vmem>>, %arg2: memref<32x2xf32, #tpu.memory_space<vmem>>, %arg3: memref<1x2xf32, #tpu.memory_space<vmem>>, %arg4: memref<2x32xf32, #tpu.memory_space<vmem>>, %arg5: memref<1x32xf32, #tpu.memory_space<vmem>>, %arg6: memref<1x32x256xf32, #tpu.memory_space<vmem>>) attributes {dimension_semantics = [#tpu.dimension_semantics<parallel>], iteration_bounds = array<i64: 2>, scalar_prefetch = 0 : i64, scratch_operands = 0 : i64, tpu.core_type = #tpu.core_type<tc>, window_params = [{transform_indices = @transform_0, window_bounds = array<i64: 1, 32, 256>}, {pipeline_mode = #tpu.pipeline_mode<synchronous>, transform_indices = @transform_1, window_bounds = array<i64: 32, 2>}, {pipeline_mode = #tpu.pipeline_mode<synchronous>, transform_indices = @transform_2, window_bounds = array<i64: 1, 2>}, {pipeline_mode = #tpu.pipeline_mode<synchronous>, transform_indices = @transform_3, window_bounds = array<i64: 2, 32>}, {pipeline_mode = #tpu.pipeline_mode<synchronous>, transform_indices = @transform_4, window_bounds = array<i64: 1, 32>}, {transform_indices = @transform_5, window_bounds = array<i64: 1, 32, 256>}]} {
    %c0 = arith.constant 0 : index
    %c0_0 = arith.constant 0 : index
    %c0_1 = arith.constant 0 : index
    %0 = vector.load %arg1[%c0, %c0_0, %c0_1] : memref<1x32x256xf32, #tpu.memory_space<vmem>>, vector<1x32x256xf32>
    %cst = arith.constant dense<0.000000e+00> : vector<1x32xf32>
    %1 = vector.multi_reduction <add>, %0, %cst [2] : vector<1x32x256xf32> to vector<1x32xf32>
    %cst_2 = arith.constant 3.906250e-03 : f32
    %2 = vector.broadcast %cst_2 : f32 to vector<1x32xf32>
    %3 = arith.mulf %1, %2 : vector<1x32xf32>
    %cst_3 = arith.constant dense<0xFF800000> : vector<1x32xf32>
    %4 = vector.multi_reduction <maximumf>, %0, %cst_3 [2] : vector<1x32x256xf32> to vector<1x32xf32>
    %c0_4 = arith.constant 0 : index
    %c0_5 = arith.constant 0 : index
    %5 = vector.load %arg2[%c0_4, %c0_5] : memref<32x2xf32, #tpu.memory_space<vmem>>, vector<32x2xf32>
    %c0_6 = arith.constant 0 : index
    %c0_7 = arith.constant 0 : index
    %6 = vector.load %arg3[%c0_6, %c0_7] : memref<1x2xf32, #tpu.memory_space<vmem>>, vector<1x2xf32>
    %c0_8 = arith.constant 0 : index
    %c0_9 = arith.constant 0 : index
    %7 = vector.load %arg4[%c0_8, %c0_9] : memref<2x32xf32, #tpu.memory_space<vmem>>, vector<2x32xf32>
    %c0_10 = arith.constant 0 : index
    %c0_11 = arith.constant 0 : index
    %8 = vector.load %arg5[%c0_10, %c0_11] : memref<1x32xf32, #tpu.memory_space<vmem>>, vector<1x32xf32>
    %9 = vector.shape_cast %3 : vector<1x32xf32> to vector<1x32x1xf32>
    %10 = vector.shape_cast %5 : vector<32x2xf32> to vector<1x32x2xf32>
    %11 = vector.broadcast %9 : vector<1x32x1xf32> to vector<1x32x2xf32>
    %12 = arith.mulf %11, %10 : vector<1x32x2xf32>
    %cst_12 = arith.constant dense<0.000000e+00> : vector<1x2xf32>
    %13 = vector.multi_reduction <add>, %12, %cst_12 [1] : vector<1x32x2xf32> to vector<1x2xf32>
    %14 = arith.addf %13, %6 : vector<1x2xf32>
    %cst_13 = arith.constant 0.000000e+00 : f32
    %15 = vector.broadcast %cst_13 : f32 to vector<1x2xf32>
    %16 = arith.maximumf %14, %15 : vector<1x2xf32>
    %17 = vector.shape_cast %16 : vector<1x2xf32> to vector<1x2x1xf32>
    %18 = vector.shape_cast %7 : vector<2x32xf32> to vector<1x2x32xf32>
    %19 = vector.broadcast %17 : vector<1x2x1xf32> to vector<1x2x32xf32>
    %20 = arith.mulf %19, %18 : vector<1x2x32xf32>
    %cst_14 = arith.constant dense<0.000000e+00> : vector<1x32xf32>
    %21 = vector.multi_reduction <add>, %20, %cst_14 [1] : vector<1x2x32xf32> to vector<1x32xf32>
    %22 = arith.addf %21, %8 : vector<1x32xf32>
    %23 = vector.shape_cast %4 : vector<1x32xf32> to vector<1x32x1xf32>
    %24 = vector.shape_cast %5 : vector<32x2xf32> to vector<1x32x2xf32>
    %25 = vector.broadcast %23 : vector<1x32x1xf32> to vector<1x32x2xf32>
    %26 = arith.mulf %25, %24 : vector<1x32x2xf32>
    %cst_15 = arith.constant dense<0.000000e+00> : vector<1x2xf32>
    %27 = vector.multi_reduction <add>, %26, %cst_15 [1] : vector<1x32x2xf32> to vector<1x2xf32>
    %28 = arith.addf %27, %6 : vector<1x2xf32>
    %cst_16 = arith.constant 0.000000e+00 : f32
    %29 = vector.broadcast %cst_16 : f32 to vector<1x2xf32>
    %30 = arith.maximumf %28, %29 : vector<1x2xf32>
    %31 = vector.shape_cast %30 : vector<1x2xf32> to vector<1x2x1xf32>
    %32 = vector.shape_cast %7 : vector<2x32xf32> to vector<1x2x32xf32>
    %33 = vector.broadcast %31 : vector<1x2x1xf32> to vector<1x2x32xf32>
    %34 = arith.mulf %33, %32 : vector<1x2x32xf32>
    %cst_17 = arith.constant dense<0.000000e+00> : vector<1x32xf32>
    %35 = vector.multi_reduction <add>, %34, %cst_17 [1] : vector<1x2x32xf32> to vector<1x32xf32>
    %36 = arith.addf %35, %8 : vector<1x32xf32>
    %37 = arith.addf %22, %36 : vector<1x32xf32>
    %38 = arith.negf %37 : vector<1x32xf32>
    %39 = math.exp %38 : vector<1x32xf32>
    %cst_18 = arith.constant 1.000000e+00 : f32
    %40 = vector.broadcast %cst_18 : f32 to vector<1x32xf32>
    %41 = arith.addf %40, %39 : vector<1x32xf32>
    %42 = arith.divf %40, %41 : vector<1x32xf32>
    %43 = vector.shape_cast %42 : vector<1x32xf32> to vector<1x32x1xf32>
    %44 = vector.broadcast %43 : vector<1x32x1xf32> to vector<1x32x256xf32>
    %45 = arith.mulf %0, %44 : vector<1x32x256xf32>
    %c0_19 = arith.constant 0 : index
    %c0_20 = arith.constant 0 : index
    %c0_21 = arith.constant 0 : index
    %46 = vector.load %arg6[%c0_19, %c0_20, %c0_21] : memref<1x32x256xf32, #tpu.memory_space<vmem>>, vector<1x32x256xf32>
    tpu.vector_store %arg6[%c0_19, %c0_20, %c0_21], %45 {strides = array<i32>} : memref<1x32x256xf32, #tpu.memory_space<vmem>>, vector<1x32x256xf32>,
    return
  }
  func.func @transform_0(%arg0: i32) -> (i32, i32, i32) {
    %c0_i32 = arith.constant 0 : i32
    %c0_i32_0 = arith.constant 0 : i32
    %c0_i32_1 = arith.constant 0 : i32
    return %arg0, %c0_i32, %c0_i32_0 : i32, i32, i32
  }
  func.func @transform_1(%arg0: i32) -> (i32, i32) {
    %c0_i32 = arith.constant 0 : i32
    %c0_i32_0 = arith.constant 0 : i32
    %c0_i32_1 = arith.constant 0 : i32
    return %c0_i32, %c0_i32_0 : i32, i32
  }
  func.func @transform_2(%arg0: i32) -> (i32, i32) {
    %c0_i32 = arith.constant 0 : i32
    %c0_i32_0 = arith.constant 0 : i32
    %c0_i32_1 = arith.constant 0 : i32
    return %c0_i32, %c0_i32_0 : i32, i32
  }
  func.func @transform_3(%arg0: i32) -> (i32, i32) {
    %c0_i32 = arith.constant 0 : i32
    %c0_i32_0 = arith.constant 0 : i32
    %c0_i32_1 = arith.constant 0 : i32
    return %c0_i32, %c0_i32_0 : i32, i32
  }
  func.func @transform_4(%arg0: i32) -> (i32, i32) {
    %c0_i32 = arith.constant 0 : i32
    %c0_i32_0 = arith.constant 0 : i32
    %c0_i32_1 = arith.constant 0 : i32
    return %c0_i32, %c0_i32_0 : i32, i32
  }
  func.func @transform_5(%arg0: i32) -> (i32, i32, i32) {
    %c0_i32 = arith.constant 0 : i32
    %c0_i32_0 = arith.constant 0 : i32
    %c0_i32_1 = arith.constant 0 : i32
    return %arg0, %c0_i32, %c0_i32_0 : i32, i32, i32
  }
}

</mosaic_0001>

<bundles_post_ra>
// kernel: channel_gate.1
= control target key start
LH: loop header
LB: loop body
LE: loop exit
PB: predicated region body
PF: predicated region fallthrough
CT: control target
= control target key end

     0   :  { %s527_s18 = smov 0   ;;  %s628_s0 = inlined_call_operand.vmem [shape: f32[2,32,256], index: 0, kind: input, shape index: {}]   ;;  %s629_s1 = inlined_call_operand.vmem [shape: f32[32,2], index: 1, kind: input, shape index: {}]   ;;  %s630_s2 = inlined_call_operand.vmem [shape: f32[1,2], index: 2, kind: input, shape index: {}]   ;;  %s631_s3 = inlined_call_operand.vmem [shape: f32[2,32], index: 3, kind: input, shape index: {}]   ;;  %s632_s4 = inlined_call_operand.vmem [shape: f32[1,32], index: 4, kind: input, shape index: {}]   ;;  %s633_s5 = inlined_call_operand.vmem [shape: f32[2,32,256], index: 5, kind: output, shape index: {}]  }
   0x1 LB: > { %s456_s19 = sadd.s32 4294967295, %s495_s18   ;;  %p460_p0 = scmp.ge.s32.totalorder %s495_s18, 1  ;;  %s495_s18 = sphi %s527_s18, %s15_s18  }
   0x2   : > { %p187_p1 = scmp.lt.s32.totalorder %s495_s18, 3 }
   0x4   : > { %p188_p2 = pnand %p460_p0, %p187_p1 }
   0x5   : > { %p215_p3 = scmp.lt.s32.totalorder (!%p188_p2), %s456_s19, 1 }
   0x6   : > { %191 = sbr.rel (%p188_p2) target bundleno = 473 (0x1d9), region = 40 }
   0xb   : > { %s635_s19 = smov (!%p215_p3, %s456_s19), 1  ;;  %v289_v16 = vlaneseq  ;;  %v261_v22 = vld [vmem:[%s629_s1] sm:$0xff]  ;;  %v262_v24 = vld [vmem:[%s629_s1 + $0x8] sm:$0xff]  ;;  %v263_v26 = vld [vmem:[%s629_s1 + $0x10] sm:$0xff]  ;;  %vm272_vm0 = vcmask 15360   ;;  %vm296_vm1 = vcmask 254976  }
   0xc   : > { %s468_s20 = sshll.u32 %s635_s19, 6  ;;  %v264_v31 = vld [vmem:[%s629_s1 + $0x18] sm:$0xff] }
   0xd   : > { %s219_s23 = scalar_lea.vmem %s628_s0, %s468_s20  ;;  %v575_v17 = vshrl.u32 %v289_v16, 7  ;;  %s224_s15 = scalar_lea.vmem %s633_s5, %s468_s20 }
   0xe   : > { %v543_v0 = vld [vmem:[%s219_s23] sm:$0xff]  ;;  %v545_v1 = vld [vmem:[%s219_s23 + $0x8] sm:$0xff]  ;;  %v553_v5 = vld [vmem:[%s219_s23 + $0x10] sm:$0xff] }
   0xf   : > { %v547_v2 = vld [vmem:[%s219_s23 + $0x20] sm:$0xff]  ;;  %v233_v3 = vadd.f32 %v545_v1, %v543_v0  ;;  %v551_v4 = vld [vmem:[%s219_s23 + $0x28] sm:$0xff]  ;;  %v555_v6 = vld [vmem:[%s219_s23 + $0x18] sm:$0xff]  ;;  %v249_v12 = vmax.f32 %v543_v0, %v545_v1  ;;  %478 = vset.pattern.permute.xlu2 %v575_v17  ;;  %479 = vset.pattern.permute.xlu0 %v575_v17 }
  0x10   : > { %v239_v7 = vadd.f32 %v551_v4, %v547_v2  ;;  %v252_v8 = vmax.f32 %v553_v5, %v555_v6  ;;  %v561_v9 = vld [vmem:[%s219_s23 + $0x30] sm:$0xff]  ;;  %v563_v10 = vld [vmem:[%s219_s23 + $0x38] sm:$0xff]  ;;  %v236_v11 = vadd.f32 %v555_v6, %v553_v5  ;;  %v255_v14 = vmax.f32 %v547_v2, %v551_v4  ;;  %480 = vset.pattern.permute.xlu1 %v575_v17 }
  0x11   : > { %234 = vadd.xlane.f32.xlu0 %v233_v3  ;;  %v242_v13 = vadd.f32 %v563_v10, %v561_v9  ;;  %v258_v15 = vmax.f32 %v561_v9, %v563_v10  ;;  %v265_v3 = vld [vmem:[%s630_s2] sm:$0x1] }
  0x12   : > { %240 = vadd.xlane.f32.xlu1 %v239_v7  ;;  %253 = vmax.xlane.f32.xlu2 %v252_v8 }
  0x19   : > { %237 = vadd.xlane.f32.xlu0 %v236_v11 }
  0x1a   : > { %250 = vmax.xlane.f32.xlu1 %v249_v12  ;;  %243 = vadd.xlane.f32.xlu2 %v242_v13 }
  0x21   : > { %256 = vmax.xlane.f32.xlu0 %v255_v14 }
  0x22   : > { %259 = vmax.xlane.f32.xlu1 %v258_v15 }
  0x84   : > { %v235_v18 = vpop.xlane.xlu0 %234 }
  0x85   : > { %v241_v19 = vpop.xlane.xlu1 %240  ;;  %v254_v20 = vpop.xlane.xlu2 %253  ;;  %v245_v21 = vmul.f32 0.00390625, %v235_v18 }
  0x86   : > { %v247_v23 = vmul.f32 0.00390625, %v241_v19  ;;  %v306_v33 = vmul.f32 %v262_v24, %v254_v20  ;;  %v266_v20 = vld [vmem:[%s631_s3] sm:$0x3] }
  0x87   : > { %v268_v29 = vmul.f32 %v261_v22, %v245_v21 }
  0x88   : > { %v270_v36 = vmul.f32 %v263_v26, %v247_v23  ;;  %v310_v41 = vsel %vm272_vm0, %v306_v33, 0.0 }
  0x89   : > { %v273_v39 = vsel %vm272_vm0, %v268_v29, 0.0 }
  0x8a   : > { %v276_v43 = vsel %vm272_vm0, %v270_v36, 0.0 }
  0x8c   : > { %v238_v25 = vpop.xlane.xlu0 %237 }
  0x8d   : > { %v246_v27 = vmul.f32 0.00390625, %v238_v25  ;;  %v251_v28 = vpop.xlane.xlu1 %250  ;;  %v244_v30 = vpop.xlane.xlu2 %243 }
  0x8e   : > { %v248_v32 = vmul.f32 0.00390625, %v244_v30  ;;  %v305_v35 = vmul.f32 %v261_v22, %v251_v28 }
  0x8f   : > { %v269_v34 = vmul.f32 %v262_v24, %v246_v27 }
  0x90   : > { %v271_v37 = vmul.f32 %v264_v31, %v248_v32  ;;  %v309_v42 = vsel %vm272_vm0, %v305_v35, 0.0 }
  0x91   : > { %v274_v38 = vsel %vm272_vm0, %v269_v34, 0.0  ;;  %v311_v49 = vadd.f32 %v310_v41, %v309_v42 }
  0x92   : > { %v275_v40 = vadd.f32 %v274_v38, %v273_v39  ;;  %v278_v44 = vsel %vm272_vm0, %v271_v37, 0.0  ;;  %v267_v39 = vld [vmem:[%s632_s4] sm:$0x1] }
  0x94   : > { %v277_v45 = vadd.f32 %v276_v43, %v275_v40  ;;  %v257_v46 = vpop.xlane.xlu0 %256 }
  0x95   : > { %v307_v47 = vmul.f32 %v263_v26, %v257_v46  ;;  %v260_v48 = vpop.xlane.xlu1 %259  ;;  %v369_v26 = vadd.s32 8, %v575_v17 }
  0x96   : > { %v279_v50 = vadd.f32 %v278_v44, %v277_v45  ;;  %v308_v51 = vmul.f32 %v264_v31, %v260_v48  ;;  %v381_v45 = vadd.s32 24, %v575_v17 }
  0x97   : > { %v312_v52 = vsel %vm272_vm0, %v307_v47, 0.0 }
  0x98   : > { %v313_v53 = vadd.f32 %v312_v52, %v311_v49  ;;  %v280_v54 = vrot.slane %v279_v50, 4  ;;  %v314_v55 = vsel %vm272_vm0, %v308_v51, 0.0 }
  0x9a   : > { %v281_v56 = vadd.f32 %v280_v54, %v279_v50  ;;  %v315_v57 = vadd.f32 %v314_v55, %v313_v53 }
  0x9c   : > { %v282_v58 = vrot.slane %v281_v56, 2  ;;  %v316_v59 = vrot.slane %v315_v57, 4 }
  0x9e   : > { %v317_v60 = vadd.f32 %v316_v59, %v315_v57  ;;  %v283_v61 = vadd.f32 %v282_v58, %v281_v56  ;;  %v375_v59 = vadd.s32 16, %v575_v17 }
  0xa0   : > { %v318_v62 = vrot.slane %v317_v60, 2  ;;  %v284_v63 = vrot.slane %v283_v61, 1 }
  0xa2   : > { %v319_v7 = vadd.f32 %v318_v62, %v317_v60  ;;  %v285_v8 = vadd.f32 %v284_v63, %v283_v61 }
  0xa4   : > { %v286_v11 = vadd.f32 %v285_v8, %v265_v3  ;;  %v320_v12 = vrot.slane %v319_v7, 1 }
  0xa6   : > { %v287_v13 = vmax.f32 %v286_v11, 0.0  ;;  %v321_v14 = vadd.f32 %v320_v12, %v319_v7 }
  0xa8   : > { %v288_v15 = vperm.slane %v287_v13, 0  ;;  %v322_v16 = vadd.f32 %v321_v14, %v265_v3 }
  0xaa   : > { %293 = vperm.xlu2 %478, %v288_v15   ;;  %v323_v18 = vmax.f32 %v322_v16, 0.0 }
  0xac   : > { %v324_v19 = vperm.slane %v323_v18, 0 }
  0xae   : > { %329 = vperm.xlu0 %479, %v324_v19  }
  0xb2   : > { %481 = vset.pattern.permute.xlu2 %v369_v26 }
  0xb6   : > { %484 = vset.pattern.permute.xlu0 %v381_v45 }
 0x104   : > { %v294_v21 = vpop.permute.xlu2 %293 }
 0x105   : > { %v295_v22 = vmul.f32 %v294_v21, %v266_v20 }
 0x107   : > { %v297_v23 = vsel %vm296_vm1, %v295_v22, 0.0 }
 0x108   : > { %v298_v24 = vrot.slane %v297_v23, 4 }
 0x10a   : > { %v299_v25 = vadd.f32 %v298_v24, %v297_v23 }
 0x10c   : > { %v300_v27 = vrot.slane %v299_v25, 2 }
 0x10e   : > { %v301_v31 = vadd.f32 %v300_v27, %v299_v25 }
 0x110   : > { %v302_v34 = vrot.slane %v301_v31, 1 }
 0x112   : > { %v303_v37 = vadd.f32 %v302_v34, %v301_v31 }
 0x114   : > { %v304_v41 = vadd.f32 %v303_v37, %v267_v39 }
 0x120   : > { %v330_v28 = vpop.permute.xlu0 %329 }
 0x121   : > { %v331_v29 = vmul.f32 %v330_v28, %v266_v20 }
 0x123   : > { %v332_v30 = vsel %vm296_vm1, %v331_v29, 0.0 }
 0x124   : > { %v333_v32 = vrot.slane %v332_v30, 4 }
 0x126   : > { %v334_v33 = vadd.f32 %v333_v32, %v332_v30 }
 0x128   : > { %v335_v35 = vrot.slane %v334_v33, 2 }
 0x12a   : > { %v336_v36 = vadd.f32 %v335_v35, %v334_v33 }
 0x12c   : > { %v337_v38 = vrot.slane %v336_v36, 1 }
 0x12e   : > { %v338_v40 = vadd.f32 %v337_v38, %v336_v36 }
 0x130   : > { %v339_v42 = vadd.f32 %v338_v40, %v267_v39 }
 0x132   : > { %v340_v43 = vadd.f32 %v339_v42, %v304_v41 }
 0x134   : > { %v465_v44 = vmul.f32 -1.442695, %v340_v43 }
 0x136   : > { %485 = vpow2.f32 %v465_v44 }
 0x13c   : > { %v486_v46 = vpop.eup %485 }
 0x13d   : > { %v344_v47 = vadd.f32 1.0, %v486_v46 }
 0x13f   : > { %487 = vrcp.f32 %v344_v47  ;;  %v356_v51 = vand.u32 2147483648, %v344_v47  ;;  %v354_v53 = vand.u32 2147483647, %v344_v47  ;;  %vm350_vm3 = vweird.f32 %v344_v47 }
 0x141   : > { %v357_v55 = vor.u32 1.1754944e-38, %v356_v51  ;;  %vm355_vm5 = vcmp.eq.f32.partialorder %v354_v53, 8.507059e+37 }
 0x145   : > { %v488_v48 = vpop.eup %487 }
 0x146   : > { %v346_v49 = vmul.f32 %v488_v48, %v344_v47  ;;  %vm351_vm2 = vweird.f32 %v488_v48 }
 0x147   : > { %vm352_vm4 = vmor %vm350_vm3, %vm351_vm2 }
 0x148   : > { %v347_v50 = vsub.f32 1.0, %v346_v49 }
 0x14a   : > { %v348_v52 = vmul.f32 %v488_v48, %v347_v50 }
 0x14c   : > { %v349_v54 = vadd.f32 %v488_v48, %v348_v52 }
 0x14e   : > { %v353_v56 = vsel %vm352_vm4, %v488_v48, %v349_v54 }
 0x14f   : > { %v358_v57 = vsel %vm355_vm5, %v357_v55, %v353_v56 }
 0x150   : > { %v360_v58 = vperm.slane %v358_v57, 0 }
 0x152   : > { %371 = vperm.xlu2 %481, %v360_v58   ;;  %365 = vperm.xlu1 %480, %v360_v58  }
 0x15a   : > { %482 = vset.pattern.permute.xlu2 %v375_v59  ;;  %483 = vset.pattern.permute.xlu1 %v381_v45 }
 0x162   : > { %377 = vperm.xlu2 %482, %v360_v58   ;;  %383 = vperm.xlu1 %483, %v360_v58  }
 0x1ac   : > { %v372_v60 = vpop.permute.xlu2 %371 }
 0x1ad   : > { %v387_v61 = vmul.f32 %v372_v60, %v553_v5  ;;  %v388_v62 = vmul.f32 %v372_v60, %v555_v6 }
 0x1af   : > { %395 = vst [vmem:[%s224_s15 + $0x10] sm:$0xff] %v387_v61 }
 0x1b0   : > { %396 = vst [vmem:[%s224_s15 + $0x18] sm:$0xff] %v388_v62 }
 0x1bc   : > { %v378_v63 = vpop.permute.xlu2 %377 }
 0x1bd   : > { %v389_v3 = vmul.f32 %v378_v63, %v547_v2  ;;  %v390_v17 = vmul.f32 %v378_v63, %v551_v4 }
 0x1bf   : > { %397 = vst [vmem:[%s224_s15 + $0x20] sm:$0xff] %v389_v3 }
 0x1c0   : > { %398 = vst [vmem:[%s224_s15 + $0x28] sm:$0xff] %v390_v17 }
 0x1c4   : > { %v366_v7 = vpop.permute.xlu1 %365 }
 0x1c5   : > { %v385_v8 = vmul.f32 %v366_v7, %v543_v0  ;;  %v386_v11 = vmul.f32 %v366_v7, %v545_v1 }
 0x1c7   : > { %393 = vst [vmem:[%s224_s15] sm:$0xff] %v385_v8 }
 0x1c8   : > { %394 = vst [vmem:[%s224_s15 + $0x8] sm:$0xff] %v386_v11 }
 0x1d4   : > { %v384_v12 = vpop.permute.xlu1 %383 }
 0x1d5   : > { %v391_v5 = vmul.f32 %v384_v12, %v561_v9  ;;  %v392_v6 = vmul.f32 %v384_v12, %v563_v10 }
 0x1d7   : > { %399 = vst [vmem:[%s224_s15 + $0x30] sm:$0xff] %v391_v5 }
 0x1d8   : > { %400 = vst [vmem:[%s224_s15 + $0x38] sm:$0xff] %v392_v6 }
 0x1d9 PF: > { %s15_s18 = sadd.s32 1, %s495_s18  }
 0x1da   : > { %p12_p4 = scmp.ge.s32.totalorder %s15_s18, 4  }
 0x1dc   :  { %14 = sbr.rel (!%p12_p4) target bundleno = 1 (0x1), region = 70 }

</bundles_post_ra>
